<compile_context>
chip_gen: v7x
topology: tpu7x:2x2x1
jax: 0.10.0
libtpu: 0.0.40
codegen_flags: <defaults>
</compile_context>

<pallas_src>
import functools

import jax
import jax.numpy as jnp
from jax.experimental import pallas as pl
from jax.experimental.pallas import tpu as pltpu


def _mlp_kernel(x_ref, w1_ref, b1_ref, w2_ref, b2_ref, o_ref):
    # Layer 1 on the MXU: bf16 x bf16 -> f32 accumulate; bias + ReLU on the VPU (f32).
    h = jnp.dot(x_ref[...], w1_ref[...], preferred_element_type=jnp.float32)   # (TB, H)
    h = jnp.maximum(h + b1_ref[...], 0.0)

    # Layer 2 (H -> 1): elementwise multiply (VPU) + lane reduction (XLU) instead
    # of an N=1 MXU matmul (which would waste 255/256 of every systolic column).
    y = jnp.sum(h * w2_ref[...], axis=-1)                                       # (TB,)
    y = jax.nn.sigmoid(y + b2_ref[0, 0])                                        # scalar bias from SMEM; sigmoid -> EUP

    # Lane-dense store: (TB//128, 128) slab per step; full unmasked (8,128) vreg
    # tiles once TB >= 1024. The reshape is a small relayout of TB scalars only.
    o_ref[...] = y.reshape(o_ref.shape).astype(o_ref.dtype)


def _round_up(n, m):
    return ((n + m - 1) // m) * m


@functools.partial(jax.jit, static_argnames=("batch_tile",))
def neural_net2_forward(x, w1, b1, w2, b2, *, batch_tile=1024):
    """x: (B, in) f32, w1: (in, H), b1: (1, H), w2: (H, 1), b2: (1, 1) -> (B, 1) f32."""
    B, IN = x.shape
    H = w1.shape[1]
    assert batch_tile % 128 == 0, "batch_tile must be a multiple of 128"

    # ---- pick the batch tile --------------------------------------------------
    # Pad batch to a multiple of 128 (lane width) and choose TB so that:
    #  * TB is a multiple of 128 (dense lane-major output slabs),
    #  * TB <= batch_tile (default 1024 -> full (8,128) output tiles),
    #  * num_blocks >= 2 whenever the batch allows it (v7x has 2 TensorCores and
    #    "parallel" grid axes are sharded across them).
    B128 = _round_up(B, 128)
    TB = min(batch_tile, B128)
    if B128 >= 2 * 128 and B128 < 2 * TB:
        TB = _round_up((B128 + 1) // 2, 128)
    B_pad = _round_up(B, TB)
    num_blocks = B_pad // TB
    TPG = TB // 128                      # 128-row batch groups per block (output sublane rows)

    if B_pad != B:
        x = jnp.pad(x, ((0, B_pad - B), (0, 0)))   # padded rows are sliced off below

    # bf16 inputs for the MXU (f32 x f32 is not a native MXU path); f32 epilogue.
    x_bf16 = x.astype(jnp.bfloat16)
    w1_bf16 = w1.astype(jnp.bfloat16)
    b1_f32 = b1.reshape(1, H).astype(jnp.float32)
    w2_row = w2.reshape(1, H).astype(jnp.float32)   # row layout for VPU broadcast
    b2_s = b2.reshape(1, 1).astype(jnp.float32)     # scalar -> SMEM

    cost = pl.CostEstimate(
        flops=2 * B_pad * IN * H + 4 * B_pad * H,           # matmul + bias/relu/mul/reduce
        transcendentals=B_pad,                              # sigmoid
        bytes_accessed=2 * (B_pad * IN + IN * H) + 4 * (2 * H + 1 + B_pad),
    )

    out = pl.pallas_call(
        _mlp_kernel,
        out_shape=jax.ShapeDtypeStruct((num_blocks, TPG, 128), jnp.float32),
        grid=(num_blocks,),
        in_specs=[
            # x: batch-tiled, auto double-buffered by the BlockSpec pipeline.
            pl.BlockSpec((TB, IN), lambda i: (i, 0)),
            # Weights/biases pinned: same block every step -> DMA'd once, VMEM-resident.
            # TODO(synk): on v7x with production-size weights, make these single-buffered
            # (pipeline_mode=pl.Buffered(1) or one-shot copy into scratch) so constant
            # blocks don't consume 2x VMEM out of the 64 MiB budget.
            pl.BlockSpec((IN, H), lambda i: (0, 0)),
            pl.BlockSpec((1, H), lambda i: (0, 0)),
            pl.BlockSpec((1, H), lambda i: (0, 0)),
            # b2 is a single scalar: keep it in SMEM, not a padded VMEM tile.
            pl.BlockSpec((1, 1), lambda i: (0, 0), memory_space=pltpu.MemorySpace.SMEM),
        ],
        # Lane-dense output slabs; middle dim equals the full array dim so any TPG is legal,
        # and TPG == 8 (TB == 1024) gives fully unmasked (8,128) stores.
        out_specs=pl.BlockSpec((1, TPG, 128), lambda i: (i, 0, 0)),
        compiler_params=pltpu.CompilerParams(
            dimension_semantics=("parallel",),              # megacore split on v7x
            vmem_limit_bytes=32 * 1024 * 1024,              # safe within v7x's 64 MiB; v5e/v6e have headroom to raise
        ),
        cost_estimate=cost,
    )(x_bf16, w1_bf16, b1_f32, w2_row, b2_s)

    # (num_blocks, TPG, 128) flattens in batch order: b = block*TB + group*128 + lane.
    return out.reshape(B_pad)[:B].reshape(B, 1)


def init_params(key, input_size, hidden_size):
    """Deterministic init mimicking torch.nn.Linear default (U[-1/sqrt(fan_in), 1/sqrt(fan_in)])."""
    k1, k2, k3, k4 = jax.random.split(key, 4)
    lim1 = 1.0 / (input_size ** 0.5)
    lim2 = 1.0 / (hidden_size ** 0.5)
    w1 = jax.random.uniform(k1, (input_size, hidden_size), jnp.float32, -lim1, lim1)
    b1 = jax.random.uniform(k2, (1, hidden_size), jnp.float32, -lim1, lim1)
    w2 = jax.random.uniform(k3, (hidden_size, 1), jnp.float32, -lim2, lim2)
    b2 = jax.random.uniform(k4, (1, 1), jnp.float32, -lim2, lim2)
    return w1, b1, w2, b2


if __name__ == "__main__":
    # Lane-aligned model dims (128); small batch for the demo.
    batch, input_size, hidden_size = 8, 128, 128

    key = jax.random.PRNGKey(0)
    kx, kp, kx2 = jax.random.split(key, 3)
    x = jax.random.normal(kx, (batch, input_size), jnp.float32)
    w1, b1, w2, b2 = init_params(kp, input_size, hidden_size)

    out = jax.block_until_ready(neural_net2_forward(x, w1, b1, w2, b2))
    ref = jax.nn.sigmoid(jnp.maximum(x @ w1 + b1, 0.0) @ w2 + b2)
    assert out.shape == (batch, 1), out.shape
    # bf16 MXU inputs -> looser tolerance vs. the pure-f32 reference.
    assert jnp.allclose(out, ref, atol=2e-2, rtol=2e-2), float(jnp.max(jnp.abs(out - ref)))

    # Exercise the multi-block / padded path (2 grid blocks, batch not tile-aligned).
    batch2 = 300
    x2 = jax.random.normal(kx2, (batch2, input_size), jnp.float32)
    out2 = jax.block_until_ready(neural_net2_forward(x2, w1, b1, w2, b2))
    ref2 = jax.nn.sigmoid(jnp.maximum(x2 @ w1 + b1, 0.0) @ w2 + b2)
    assert out2.shape == (batch2, 1), out2.shape
    assert jnp.allclose(out2, ref2, atol=2e-2, rtol=2e-2), float(jnp.max(jnp.abs(out2 - ref2)))

    print("KERNEL_OK")
</pallas_src>

<mosaic_0001>
module attributes {stable_mosaic.version = 11 : i64} {
  func.func @_mlp_kernel(%arg0: i32, %arg1: memref<128x128xbf16, #tpu.memory_space<vmem>>, %arg2: memref<128x128xbf16, #tpu.memory_space<vmem>>, %arg3: memref<1x128xf32, #tpu.memory_space<vmem>>, %arg4: memref<1x128xf32, #tpu.memory_space<vmem>>, %arg5: memref<1x1xf32, #tpu.memory_space<smem>>, %arg6: memref<1x1x128xf32, #tpu.memory_space<vmem>>) attributes {dimension_semantics = [#tpu.dimension_semantics<parallel>], iteration_bounds = array<i64: 1>, scalar_prefetch = 0 : i64, scratch_operands = 0 : i64, tpu.core_type = #tpu.core_type<tc>, window_params = [{transform_indices = @transform_0, window_bounds = array<i64: 128, 128>}, {pipeline_mode = #tpu.pipeline_mode<synchronous>, transform_indices = @transform_1, window_bounds = array<i64: 128, 128>}, {pipeline_mode = #tpu.pipeline_mode<synchronous>, transform_indices = @transform_2, window_bounds = array<i64: 1, 128>}, {pipeline_mode = #tpu.pipeline_mode<synchronous>, transform_indices = @transform_3, window_bounds = array<i64: 1, 128>}, {transform_indices = @transform_4, window_bounds = array<i64: 1, 1>}, {transform_indices = @transform_5, window_bounds = array<i64: 1, 1, 128>}]} {
    %c0 = arith.constant 0 : index
    %c0_0 = arith.constant 0 : index
    %0 = vector.load %arg1[%c0, %c0_0] : memref<128x128xbf16, #tpu.memory_space<vmem>>, vector<128x128xbf16>
    %c0_1 = arith.constant 0 : index
    %c0_2 = arith.constant 0 : index
    %1 = vector.load %arg2[%c0_1, %c0_2] : memref<128x128xbf16, #tpu.memory_space<vmem>>, vector<128x128xbf16>
    %cst = arith.constant dense<0.000000e+00> : vector<128x128xf32>
    %2 = tpu.matmul %0, %1, %cst {dimension_numbers = #tpu.dot_dimension_numbers<[1], [0], [0], [1], [0, 0, 1, 1], [], []>} : vector<128x128xbf16>, vector<128x128xbf16>, vector<128x128xf32> -> vector<128x128xf32>
    %c0_3 = arith.constant 0 : index
    %c0_4 = arith.constant 0 : index
    %3 = vector.load %arg3[%c0_3, %c0_4] : memref<1x128xf32, #tpu.memory_space<vmem>>, vector<1x128xf32>
    %4 = vector.broadcast %3 : vector<1x128xf32> to vector<128x128xf32>
    %5 = arith.addf %2, %4 : vector<128x128xf32>
    %cst_5 = arith.constant 0.000000e+00 : f32
    %6 = vector.broadcast %cst_5 : f32 to vector<128x128xf32>
    %7 = arith.maximumf %5, %6 : vector<128x128xf32>
    %c0_6 = arith.constant 0 : index
    %c0_7 = arith.constant 0 : index
    %8 = vector.load %arg4[%c0_6, %c0_7] : memref<1x128xf32, #tpu.memory_space<vmem>>, vector<1x128xf32>
    %9 = vector.broadcast %8 : vector<1x128xf32> to vector<128x128xf32>
    %10 = arith.mulf %7, %9 : vector<128x128xf32>
    %cst_8 = arith.constant dense<0.000000e+00> : vector<128xf32>
    %11 = vector.multi_reduction <add>, %10, %cst_8 [1] : vector<128x128xf32> to vector<128xf32>
    %c0_9 = arith.constant 0 : index
    %c0_10 = arith.constant 0 : index
    %12 = memref.load %arg5[%c0_9, %c0_10] : memref<1x1xf32, #tpu.memory_space<smem>>
    %13 = vector.broadcast %12 : f32 to vector<128xf32>
    %14 = arith.addf %11, %13 : vector<128xf32>
    %15 = arith.negf %14 : vector<128xf32>
    %16 = math.exp %15 : vector<128xf32>
    %cst_11 = arith.constant 1.000000e+00 : f32
    %17 = vector.broadcast %cst_11 : f32 to vector<128xf32>
    %18 = arith.addf %17, %16 : vector<128xf32>
    %19 = arith.divf %17, %18 : vector<128xf32>
    %20 = vector.shape_cast %19 : vector<128xf32> to vector<1x1x128xf32>
    %c0_12 = arith.constant 0 : index
    %c0_13 = arith.constant 0 : index
    %c0_14 = arith.constant 0 : index
    %21 = vector.load %arg6[%c0_12, %c0_13, %c0_14] : memref<1x1x128xf32, #tpu.memory_space<vmem>>, vector<1x1x128xf32>
    tpu.vector_store %arg6[%c0_12, %c0_13, %c0_14], %20 {strides = array<i32>} : memref<1x1x128xf32, #tpu.memory_space<vmem>>, vector<1x1x128xf32>,
    return
  }
  func.func @transform_0(%arg0: i32) -> (i32, i32) {
    %c0_i32 = arith.constant 0 : i32
    %c0_i32_0 = arith.constant 0 : i32
    return %arg0, %c0_i32 : i32, i32
  }
  func.func @transform_1(%arg0: i32) -> (i32, i32) {
    %c0_i32 = arith.constant 0 : i32
    %c0_i32_0 = arith.constant 0 : i32
    %c0_i32_1 = arith.constant 0 : i32
    return %c0_i32, %c0_i32_0 : i32, i32
  }
  func.func @transform_2(%arg0: i32) -> (i32, i32) {
    %c0_i32 = arith.constant 0 : i32
    %c0_i32_0 = arith.constant 0 : i32
    %c0_i32_1 = arith.constant 0 : i32
    return %c0_i32, %c0_i32_0 : i32, i32
  }
  func.func @transform_3(%arg0: i32) -> (i32, i32) {
    %c0_i32 = arith.constant 0 : i32
    %c0_i32_0 = arith.constant 0 : i32
    %c0_i32_1 = arith.constant 0 : i32
    return %c0_i32, %c0_i32_0 : i32, i32
  }
  func.func @transform_4(%arg0: i32) -> (i32, i32) {
    %c0_i32 = arith.constant 0 : i32
    %c0_i32_0 = arith.constant 0 : i32
    %c0_i32_1 = arith.constant 0 : i32
    return %c0_i32, %c0_i32_0 : i32, i32
  }
  func.func @transform_5(%arg0: i32) -> (i32, i32, i32) {
    %c0_i32 = arith.constant 0 : i32
    %c0_i32_0 = arith.constant 0 : i32
    %c0_i32_1 = arith.constant 0 : i32
    return %arg0, %c0_i32, %c0_i32_0 : i32, i32, i32
  }
}

</mosaic_0001>

<bundles_post_ra>
// kernel: neural_net2_forward.1
= control target key start
LH: loop header
LB: loop body
LE: loop exit
PB: predicated region body
PF: predicated region fallthrough
CT: control target
= control target key end

     0   :  { %vm466_vm0 = vcmask 130112   ;;  %vm473_vm1 = vcmask 195712   ;;  %vm480_vm2 = vcmask 261312   ;;  %vm487_vm3 = vcmask 326912   ;;  %s940_s1 = inlined_call_operand.vmem [shape: bf16[128,128], index: 1, kind: input, shape index: {}]   ;;  %s941_s0 = inlined_call_operand.vmem [shape: bf16[128,128], index: 0, kind: input, shape index: {}]   ;;  %s942_s2 = inlined_call_operand.vmem [shape: f32[1,128], index: 2, kind: input, shape index: {}]   ;;  %s943_s3 = inlined_call_operand.vmem [shape: f32[1,128], index: 3, kind: input, shape index: {}]   ;;  %s944_s4 = inlined_call_operand.<no memory space> [shape: f32[1,1], index: 4, kind: input, shape index: {}]   ;;  %s945_s5 = inlined_call_operand.vmem [shape: f32[1,1,128], index: 5, kind: output, shape index: {}]  }
   0x1   :  { %v670_v0 = vld [vmem:[%s940_s1] sm:$0xff]   ;;  %v671_v1 = vld [vmem:[%s940_s1 + $0x8] sm:$0xff]   ;;  %v672_v2 = vld [vmem:[%s940_s1 + $0x10] sm:$0xff]   ;;  %vm494_vm4 = vcmask 392512   ;;  %vm501_vm5 = vcmask 458112   ;;  %vm508_vm6 = vcmask 523712  }
   0x2   :  { %622 = vmatprep.subr.bf16.mxu0 %v670_v0  ;;  %654 = vmatprep.subr.bf16.mxu1 %v670_v0  ;;  %v673_v3 = vld [vmem:[%s940_s1 + $0x18] sm:$0xff]   ;;  %v678_v4 = vld [vmem:[%s941_s0] sm:$0xff]   ;;  %v675_v7 = vld [vmem:[%s940_s1 + $0x28] sm:$0xff]   ;;  %vm515_vm7 = vcmask 589312   ;;  %vm522_vm8 = vcmask 654912   ;;  %vm529_vm9 = vcmask 720512  }
   0x3   :  { %623 = vmatpush3.bf16.msra.mxu0 %v670_v0  ;;  %662 = vmatpush3.bf16.msra.mxu1 %v670_v0  ;;  %v680_v5 = vld [vmem:[%s941_s0 + $0x20] sm:$0xff]   ;;  %v676_v8 = vld [vmem:[%s940_s1 + $0x30] sm:$0xff]   ;;  %v677_v9 = vld [vmem:[%s940_s1 + $0x38] sm:$0xff]   ;;  %vm536_vm10 = vcmask 786112   ;;  %vm543_vm11 = vcmask 851712   ;;  %vm550_vm12 = vcmask 917312  }
   0x4   :  { %624 = vmatprep.subr.bf16.mxu0 %v671_v1  ;;  %655 = vmatprep.subr.bf16.mxu1 %v671_v1  ;;  %v674_v6 = vld [vmem:[%s940_s1 + $0x20] sm:$0xff]   ;;  %v679_v10 = vld [vmem:[%s941_s0 + $0x8] sm:$0xff]   ;;  %v682_v12 = vld [vmem:[%s941_s0 + $0x10] sm:$0xff]   ;;  %vm557_vm13 = vcmask 982912   ;;  %vm564_vm14 = vcmask 1048512  }
   0x5   :  { %638 = vmatprep.mubr.bf16.mxu0 %v678_v4  ;;  %646 = vmatprep.mubr.bf16.mxu1 %v680_v5  ;;  %v681_v11 = vld [vmem:[%s941_s0 + $0x28] sm:$0xff]   ;;  %v684_v13 = vld [vmem:[%s941_s0 + $0x30] sm:$0xff]   ;;  %v683_v14 = vld [vmem:[%s941_s0 + $0x18] sm:$0xff]  }
   0x6   :  { %v685_v15 = vld [vmem:[%s941_s0 + $0x38] sm:$0xff]   ;;  %v831_v16 = vld [vmem:[%s942_s2] ss:$0 sm:$0xff] }
   0x7   :  { %625 = vmatpush3.bf16.msra.mxu0 %v671_v1  ;;  %663 = vmatpush3.bf16.msra.mxu1 %v671_v1  ;;  %v839_v26 = vld [vmem:[%s943_s3] ss:$0 sm:$0xff] }
   0x8   :  { %626 = vmatprep.subr.bf16.mxu0 %v672_v2  ;;  %656 = vmatprep.subr.bf16.mxu1 %v672_v2 }
   0xb   :  { %627 = vmatpush3.bf16.msra.mxu0 %v672_v2  ;;  %664 = vmatpush3.bf16.msra.mxu1 %v672_v2 }
   0xc   :  { %628 = vmatprep.subr.bf16.mxu0 %v673_v3  ;;  %657 = vmatprep.subr.bf16.mxu1 %v673_v3 }
   0xf   :  { %629 = vmatpush3.bf16.msra.mxu0 %v673_v3  ;;  %665 = vmatpush3.bf16.msra.mxu1 %v673_v3 }
  0x10   :  { %630 = vmatprep.subr.bf16.mxu0 %v674_v6  ;;  %658 = vmatprep.subr.bf16.mxu1 %v674_v6 }
  0x13   :  { %631 = vmatpush3.bf16.msra.mxu0 %v674_v6  ;;  %666 = vmatpush3.bf16.msra.mxu1 %v674_v6 }
  0x14   :  { %632 = vmatprep.subr.bf16.mxu0 %v675_v7  ;;  %659 = vmatprep.subr.bf16.mxu1 %v675_v7 }
  0x17   :  { %633 = vmatpush3.bf16.msra.mxu0 %v675_v7  ;;  %667 = vmatpush3.bf16.msra.mxu1 %v675_v7 }
  0x18   :  { %634 = vmatprep.subr.bf16.mxu0 %v676_v8  ;;  %660 = vmatprep.subr.bf16.mxu1 %v676_v8 }
  0x1b   :  { %635 = vmatpush3.bf16.msra.mxu0 %v676_v8  ;;  %668 = vmatpush3.bf16.msra.mxu1 %v676_v8 }
  0x1c   :  { %636 = vmatprep.subr.bf16.mxu0 %v677_v9  ;;  %661 = vmatprep.subr.bf16.mxu1 %v677_v9 }
  0x1f   :  { %637 = vmatpush3.bf16.msra.mxu0 %v677_v9  ;;  %669 = vmatpush3.bf16.msra.mxu1 %v677_v9 }
  0x22   :  { %639 = vmatmul.mubr.bf16.vlgmr.msra.gmra.mrb[0].mxu0 %v679_v10  ;;  %647 = vmatmul.mubr.bf16.vlgmr.msra.gmra.mrb[0].mxu1 %v681_v11 }
  0x23   :  { %642 = vmatprep.mubr.bf16.mxu0 %v682_v12  ;;  %650 = vmatprep.mubr.bf16.mxu1 %v684_v13 }
  0x2a   :  { %643 = vmatmul.mubr.bf16.gmra.mrb[4].mxu0 %v683_v14  ;;  %651 = vmatmul.mubr.bf16.gmra.mrb[4].mxu1 %v685_v15 }
  0xf5   :  { %v640_v17 = vpop.f32.mrb[0].mxu0  ;;  %v648_v18 = vpop.f32.mrb[0].mxu1 }
  0xf6   :  { %v200_v19 = vadd.f32 %v640_v17, %v831_v16  ;;  %v191_v20 = vpop.f32.mrb[1].mxu0  ;;  %v223_v21 = vpop.f32.mrb[1].mxu1  ;;  %v232_v62 = vadd.f32 %v648_v18, %v831_v16 }
  0xf7   :  { %v192_v22 = vadd.f32 %v831_v16, %v191_v20  ;;  %v641_v23 = vpop.f32.mrb[2].mxu0  ;;  %v224_v24 = vadd.f32 %v831_v16, %v223_v21  ;;  %v649_v25 = vpop.f32.mrb[2].mxu1 }
  0xf8   :  { %v256_v27 = vmax.f32 %v200_v19, 0.0  ;;  %v203_v28 = vadd.f32 %v641_v23, %v831_v16  ;;  %v194_v29 = vpop.f32.mrb[3].mxu0  ;;  %v226_v30 = vpop.f32.mrb[3].mxu1  ;;  %v235_v60 = vadd.f32 %v649_v25, %v831_v16  ;;  %v264_v3 = vmax.f32 %v232_v62, 0.0 }
  0xf9   :  { %v254_v31 = vmax.f32 %v192_v22, 0.0  ;;  %v262_v32 = vmax.f32 %v224_v24, 0.0  ;;  %v227_v34 = vadd.f32 %v831_v16, %v226_v30  ;;  %v195_v36 = vadd.f32 %v831_v16, %v194_v29 }
  0xfa   :  { %v257_v33 = vmax.f32 %v203_v28, 0.0  ;;  %v279_v35 = vmul.f32 %v839_v26, %v256_v27  ;;  %v265_v1 = vmax.f32 %v235_v60, 0.0  ;;  %v287_v11 = vmul.f32 %v839_v26, %v264_v3 }
  0xfb   :  { %v277_v37 = vmul.f32 %v839_v26, %v254_v31  ;;  %v285_v39 = vmul.f32 %v839_v26, %v262_v32  ;;  %v263_v41 = vmax.f32 %v227_v34, 0.0  ;;  %v255_v46 = vmax.f32 %v195_v36, 0.0 }
  0xfc   :  { %297 = vadd.xlane.f32.xlu1 %v279_v35  ;;  %v280_v44 = vmul.f32 %v839_v26, %v257_v33  ;;  %v288_v8 = vmul.f32 %v839_v26, %v265_v1 }
  0xfd   :  { %293 = vadd.xlane.f32.xlu0 %v277_v37  ;;  %v644_v38 = vpop.f32.mrb[4].mxu0  ;;  %v652_v40 = vpop.f32.mrb[4].mxu1  ;;  %v286_v55 = vmul.f32 %v839_v26, %v263_v41  ;;  %v278_v57 = vmul.f32 %v839_v26, %v255_v46 }
  0xfe   :  { %v216_v42 = vadd.f32 %v644_v38, %v831_v16  ;;  %v207_v43 = vpop.f32.mrb[5].mxu0  ;;  %v239_v45 = vpop.f32.mrb[5].mxu1  ;;  %v248_v9 = vadd.f32 %v652_v40, %v831_v16 }
  0xff   :  { %v645_v47 = vpop.f32.mrb[6].mxu0  ;;  %v653_v48 = vpop.f32.mrb[6].mxu1  ;;  %v208_v56 = vadd.f32 %v831_v16, %v207_v43  ;;  %v240_v4 = vadd.f32 %v831_v16, %v239_v45 }
 0x100   :  { %299 = vadd.xlane.f32.xlu1 %v280_v44  ;;  %v219_v49 = vadd.f32 %v645_v47, %v831_v16  ;;  %v210_v50 = vpop.f32.mrb[7].mxu0  ;;  %v242_v51 = vpop.f32.mrb[7].mxu1  ;;  %v260_v52 = vmax.f32 %v216_v42, 0.0  ;;  %v251_v7 = vadd.f32 %v653_v48, %v831_v16  ;;  %v268_v14 = vmax.f32 %v248_v9, 0.0 }
 0x101   :  { %309 = vadd.xlane.f32.xlu0 %v285_v39  ;;  %v211_v54 = vadd.f32 %v831_v16, %v210_v50  ;;  %v258_v63 = vmax.f32 %v208_v56, 0.0  ;;  %v243_v0 = vadd.f32 %v831_v16, %v242_v51  ;;  %v266_v10 = vmax.f32 %v240_v4, 0.0 }
 0x102   :  { %v261_v53 = vmax.f32 %v219_v49, 0.0  ;;  %v283_v59 = vmul.f32 %v839_v26, %v260_v52  ;;  %v269_v13 = vmax.f32 %v251_v7, 0.0  ;;  %v291_v18 = vmul.f32 %v839_v26, %v268_v14 }
 0x103   :  { %v259_v61 = vmax.f32 %v211_v54, 0.0  ;;  %v281_v5 = vmul.f32 %v839_v26, %v258_v63  ;;  %v267_v6 = vmax.f32 %v243_v0, 0.0  ;;  %v289_v15 = vmul.f32 %v839_v26, %v266_v10 }
 0x104   :  { %311 = vadd.xlane.f32.xlu1 %v286_v55  ;;  %v284_v58 = vmul.f32 %v839_v26, %v261_v53  ;;  %v292_v17 = vmul.f32 %v839_v26, %v269_v13  ;;  %v873_v16 = vstv %s944_s4 }
 0x105   :  { %295 = vadd.xlane.f32.xlu0 %v278_v57  ;;  %v282_v2 = vmul.f32 %v839_v26, %v259_v61  ;;  %v290_v12 = vmul.f32 %v839_v26, %v267_v6  ;;  %v455_v61 = vlaneseq }
 0x108   :  { %307 = vadd.xlane.f32.xlu1 %v284_v58 }
 0x109   :  { %305 = vadd.xlane.f32.xlu0 %v283_v59 }
 0x10c   :  { %303 = vadd.xlane.f32.xlu1 %v282_v2 }
 0x10d   :  { %301 = vadd.xlane.f32.xlu0 %v281_v5 }
 0x110   :  { %315 = vadd.xlane.f32.xlu1 %v288_v8  ;;  %v889_v8 = vand.u32 127, %v455_v61 }
 0x111   :  { %313 = vadd.xlane.f32.xlu0 %v287_v11 }
 0x112   :  { %v461_v14 = vadd.s32 4294967288, %v889_v8 }
 0x114   :  { %319 = vadd.xlane.f32.xlu1 %v290_v12 }
 0x115   :  { %317 = vadd.xlane.f32.xlu0 %v289_v15 }
 0x118   :  { %323 = vadd.xlane.f32.xlu1 %v292_v17 }
 0x119   :  { %321 = vadd.xlane.f32.xlu0 %v291_v18 }
 0x189   :  { %v298_v19 = vpop.xlane.xlu1 %297 }
 0x18a   :  { %v294_v20 = vpop.xlane.xlu0 %293  ;;  %v329_v23 = vadd.f32 %v873_v16, %v298_v19 }
 0x18b   :  { %v327_v21 = vadd.f32 %v873_v16, %v294_v20 }
 0x18c   :  { %v592_v26 = vmul.f32 -1.442695, %v329_v23  ;;  %v468_v23 = vadd.s32 4294967280, %v889_v8 }
 0x18d   :  { %v300_v22 = vpop.xlane.xlu1 %299  ;;  %v590_v24 = vmul.f32 -1.442695, %v327_v21 }
 0x18e   :  { %v310_v25 = vpop.xlane.xlu0 %309  ;;  %v330_v27 = vadd.f32 %v873_v16, %v300_v22  ;;  %v894_v22 = vshrl.u32 %v455_v61, 7  ;;  %v531_v61 = vadd.s32 4294967208, %v889_v8 }
 0x18f   :  { %686 = vpow2.f32 %v590_v24  ;;  %v335_v36 = vadd.f32 %v873_v16, %v310_v25 }
 0x190   :  { %v593_v31 = vmul.f32 -1.442695, %v330_v27  ;;  %688 = vpow2.f32 %v592_v26 }
 0x191   :  { %v312_v28 = vpop.xlane.xlu1 %311  ;;  %v598_v44 = vmul.f32 -1.442695, %v335_v36  ;;  %v903_v36 = vadd.s32 4294967232, %v889_v8 }
 0x192   :  { %v296_v29 = vpop.xlane.xlu0 %295  ;;  %v336_v38 = vadd.f32 %v873_v16, %v312_v28  ;;  %v464_v28 = vsub.s32 %v461_v14, %v894_v22 }
 0x193   :  { %v328_v30 = vadd.f32 %v873_v16, %v296_v29 }
 0x194   :  { %v599_v47 = vmul.f32 -1.442695, %v336_v38 }
 0x195   :  { %v591_v32 = vmul.f32 -1.442695, %v328_v30  ;;  %v308_v33 = vpop.xlane.xlu1 %307  ;;  %v475_v30 = vadd.s32 4294967272, %v889_v8 }
 0x196   :  { %v334_v34 = vadd.f32 %v873_v16, %v308_v33  ;;  %v306_v35 = vpop.xlane.xlu0 %305  ;;  %v471_v33 = vsub.s32 %v468_v23, %v894_v22 }
 0x197   :  { %690 = vpow2.f32 %v591_v32  ;;  %v333_v37 = vadd.f32 %v873_v16, %v306_v35 }
 0x198   :  { %692 = vpow2.f32 %v593_v31  ;;  %v597_v39 = vmul.f32 -1.442695, %v334_v34  ;;  %v459_v34 = vsub.s32 %v889_v8, %v894_v22 }
 0x199   :  { %v596_v40 = vmul.f32 -1.442695, %v333_v37  ;;  %v304_v41 = vpop.xlane.xlu1 %303  ;;  %v687_v46 = vpop.eup %686  ;;  %v906_v37 = vadd.s32 4294967224, %v889_v8 }
 0x19a   :  { %v332_v42 = vadd.f32 %v873_v16, %v304_v41  ;;  %v302_v43 = vpop.xlane.xlu0 %301  ;;  %694 = vpow2.f32 %v597_v39  ;;  %v391_v53 = vadd.f32 1.0, %v687_v46  ;;  %v689_v55 = vpop.eup %688  ;;  %v503_v41 = vadd.s32 4294967240, %v889_v8 }
 0x19b   :  { %v331_v45 = vadd.f32 %v873_v16, %v302_v43  ;;  %696 = vpow2.f32 %v596_v40  ;;  %v393_v1 = vadd.f32 1.0, %v689_v55  ;;  %v520_v55 = vsub.s32 %v906_v37, %v894_v22 }
 0x19c   :  { %v595_v48 = vmul.f32 -1.442695, %v332_v42 }
 0x19d   :  { %v594_v49 = vmul.f32 -1.442695, %v331_v45  ;;  %v316_v50 = vpop.xlane.xlu1 %315  ;;  %v482_v45 = vadd.s32 4294967264, %v889_v8 }
 0x19e   :  { %698 = vpow2.f32 %v595_v48  ;;  %v338_v51 = vadd.f32 %v873_v16, %v316_v50  ;;  %v314_v52 = vpop.xlane.xlu0 %313  ;;  %v496_v48 = vadd.s32 4294967248, %v889_v8 }
 0x19f   :  { %700 = vpow2.f32 %v598_v44  ;;  %v337_v54 = vadd.f32 %v873_v16, %v314_v52  ;;  %v478_v44 = vsub.s32 %v475_v30, %v894_v22 }
 0x1a0   :  { %702 = vpow2.f32 %v599_v47  ;;  %v601_v56 = vmul.f32 -1.442695, %v338_v51  ;;  %v513_v51 = vsub.s32 %v903_v36, %v894_v22 }
 0x1a1   :  { %v691_v57 = vpop.eup %690  ;;  %704 = vpow2.f32 %v594_v49  ;;  %v600_v58 = vmul.f32 -1.442695, %v337_v54  ;;  %v320_v59 = vpop.xlane.xlu1 %319  ;;  %v489_v49 = vadd.s32 4294967256, %v889_v8 }
 0x1a2   :  { %v693_v60 = vpop.eup %692  ;;  %v392_v62 = vadd.f32 1.0, %v691_v57  ;;  %706 = vpow2.f32 %v601_v56  ;;  %v340_v63 = vadd.f32 %v873_v16, %v320_v59  ;;  %v318_v0 = vpop.xlane.xlu0 %317  ;;  %v506_v57 = vsub.s32 %v503_v41, %v894_v22 }
 0x1a3   :  { %708 = vrcp.f32 %v391_v53  ;;  %v339_v2 = vadd.f32 %v873_v16, %v318_v0  ;;  %v394_v4 = vadd.f32 1.0, %v693_v60  ;;  %v485_v60 = vsub.s32 %v482_v45, %v894_v22 }
 0x1a4   :  { %710 = vrcp.f32 %v392_v62  ;;  %v603_v3 = vmul.f32 -1.442695, %v340_v63  ;;  %v695_v7 = vpop.eup %694  ;;  %v499_v63 = vsub.s32 %v496_v48, %v894_v22  ;;  %v492_v0 = vsub.s32 %v489_v49, %v894_v22 }
 0x1a5   :  { %712 = vpow2.f32 %v600_v58  ;;  %v602_v5 = vmul.f32 -1.442695, %v339_v2  ;;  %v324_v6 = vpop.xlane.xlu1 %323  ;;  %v697_v11 = vpop.eup %696  ;;  %v398_v25 = vadd.f32 1.0, %v695_v7  ;;  %v538_v7 = vadd.s32 4294967200, %v889_v8 }
 0x1a6   :  { %714 = vpow2.f32 %v603_v3  ;;  %v342_v9 = vadd.f32 %v873_v16, %v324_v6  ;;  %v322_v10 = vpop.xlane.xlu0 %321  ;;  %v397_v15 = vadd.f32 1.0, %v697_v11 }
 0x1a7   :  { %716 = vrcp.f32 %v393_v1  ;;  %v341_v12 = vadd.f32 %v873_v16, %v322_v10  ;;  %v524_v1 = vadd.s32 4294967216, %v889_v8 }
 0x1a8   :  { %v699_v13 = vpop.eup %698  ;;  %718 = vpow2.f32 %v602_v5  ;;  %v605_v17 = vmul.f32 -1.442695, %v342_v9 }
 0x1a9   :  { %v701_v18 = vpop.eup %700  ;;  %720 = vrcp.f32 %v394_v4  ;;  %v396_v19 = vadd.f32 1.0, %v699_v13  ;;  %v604_v20 = vmul.f32 -1.442695, %v341_v12  ;;  %v534_v12 = vsub.s32 %v531_v61, %v894_v22 }
 0x1aa   :  { %v703_v21 = vpop.eup %702  ;;  %722 = vrcp.f32 %v397_v15  ;;  %v399_v27 = vadd.f32 1.0, %v701_v18 }
 0x1ab   :  { %v705_v24 = vpop.eup %704  ;;  %724 = vrcp.f32 %v396_v19  ;;  %v400_v31 = vadd.f32 1.0, %v703_v21  ;;  %v545_v21 = vadd.s32 4294967192, %v889_v8 }
 0x1ac   :  { %v707_v16 = vpop.eup %706  ;;  %v395_v26 = vadd.f32 1.0, %v705_v24  ;;  %726 = vpow2.f32 %v605_v17  ;;  %v527_v17 = vsub.s32 %v524_v1, %v894_v22 }
 0x1ad   :  { %v709_v29 = vpop.eup %708  ;;  %728 = vpow2.f32 %v604_v20  ;;  %v402_v38 = vadd.f32 1.0, %v707_v16  ;;  %v541_v16 = vsub.s32 %v538_v7, %v894_v22  ;;  %v548_v36 = vsub.s32 %v545_v21, %v894_v22 }
 0x1ae   :  { %v711_v32 = vpop.eup %710  ;;  %730 = vrcp.f32 %v395_v26  ;;  %v460_v47 = vrot.slane %v709_v29, %v459_v34  ;;  %v552_v29 = vadd.s32 4294967184, %v889_v8 }
 0x1af   :  { %v713_v35 = vpop.eup %712  ;;  %732 = vrcp.f32 %v398_v25  ;;  %v465_v40 = vrot.slane %v711_v32, %v464_v28  ;;  %v559_v32 = vadd.s32 4294967176, %v889_v8 }
 0x1b0   :  { %v715_v39 = vpop.eup %714  ;;  %734 = vrcp.f32 %v399_v27  ;;  %v401_v42 = vadd.f32 1.0, %v713_v35 }
 0x1b1   :  { %v717_v43 = vpop.eup %716  ;;  %736 = vrcp.f32 %v400_v31  ;;  %v404_v52 = vadd.f32 1.0, %v715_v39  ;;  %v467_v56 = vsel %vm466_vm0, %v465_v40, %v460_v47 }
 0x1b2   :  { %v719_v46 = vpop.eup %718  ;;  %738 = vrcp.f32 %v401_v42  ;;  %v472_v59 = vrot.slane %v717_v43, %v471_v33  ;;  %v555_v42 = vsub.s32 %v552_v29, %v894_v22 }
 0x1b3   :  { %v721_v50 = vpop.eup %720  ;;  %740 = vrcp.f32 %v402_v38  ;;  %v403_v53 = vadd.f32 1.0, %v719_v46 }
 0x1b4   :  { %v723_v54 = vpop.eup %722  ;;  %v474_v3 = vsel %vm473_vm1, %v472_v59, %v467_v56  ;;  %v479_v6 = vrot.slane %v721_v50, %v478_v44  ;;  %v562_v44 = vsub.s32 %v559_v32, %v894_v22 }
 0x1b5   :  { %v725_v58 = vpop.eup %724  ;;  %742 = vrcp.f32 %v403_v53  ;;  %v500_v19 = vrot.slane %v723_v54, %v499_v63 }
 0x1b6   :  { %v727_v62 = vpop.eup %726  ;;  %744 = vrcp.f32 %v404_v52  ;;  %v493_v14 = vrot.slane %v725_v58, %v492_v0  ;;  %v481_v15 = vsel %vm480_vm2, %v479_v6, %v474_v3 }
 0x1b7   :  { %v729_v2 = vpop.eup %728  ;;  %v406_v4 = vadd.f32 1.0, %v727_v62 }
 0x1b8   :  { %v731_v5 = vpop.eup %730  ;;  %v405_v9 = vadd.f32 1.0, %v729_v2 }
 0x1b9   :  { %v733_v10 = vpop.eup %732  ;;  %v486_v11 = vrot.slane %v731_v5, %v485_v60  ;;  %746 = vrcp.f32 %v406_v4 }
 0x1ba   :  { %v735_v13 = vpop.eup %734  ;;  %748 = vrcp.f32 %v405_v9  ;;  %v507_v24 = vrot.slane %v733_v10, %v506_v57 }
 0x1bb   :  { %v737_v18 = vpop.eup %736  ;;  %v488_v20 = vsel %vm487_vm3, %v486_v11, %v481_v15  ;;  %v514_v28 = vrot.slane %v735_v13, %v513_v51 }
 0x1bc   :  { %v739_v23 = vpop.eup %738  ;;  %v495_v25 = vsel %vm494_vm4, %v493_v14, %v488_v20  ;;  %v521_v30 = vrot.slane %v737_v18, %v520_v55 }
 0x1bd   :  { %v741_v27 = vpop.eup %740  ;;  %v502_v26 = vsel %vm501_vm5, %v500_v19, %v495_v25  ;;  %v528_v35 = vrot.slane %v739_v23, %v527_v17 }
 0x1be   :  { %v509_v31 = vsel %vm508_vm6, %v507_v24, %v502_v26  ;;  %v535_v37 = vrot.slane %v741_v27, %v534_v12 }
 0x1bf   :  { %v743_v33 = vpop.eup %742  ;;  %v516_v34 = vsel %vm515_vm7, %v514_v28, %v509_v31 }
 0x1c0   :  { %v523_v38 = vsel %vm522_vm8, %v521_v30, %v516_v34  ;;  %v542_v39 = vrot.slane %v743_v33, %v541_v16  ;;  %v745_v40 = vpop.eup %744 }
 0x1c1   :  { %v530_v41 = vsel %vm529_vm9, %v528_v35, %v523_v38  ;;  %v549_v47 = vrot.slane %v745_v40, %v548_v36 }
 0x1c2   :  { %v537_v43 = vsel %vm536_vm10, %v535_v37, %v530_v41 }
 0x1c3   :  { %v747_v45 = vpop.eup %746  ;;  %v544_v46 = vsel %vm543_vm11, %v542_v39, %v537_v43 }
 0x1c4   :  { %v749_v8 = vpop.eup %748  ;;  %v563_v49 = vrot.slane %v747_v45, %v562_v44  ;;  %v551_v50 = vsel %vm550_vm12, %v549_v47, %v544_v46 }
 0x1c5   :  { %v556_v48 = vrot.slane %v749_v8, %v555_v42 }
 0x1c7   :  { %v558_v51 = vsel %vm557_vm13, %v556_v48, %v551_v50 }
 0x1c8   :  { %v565_v52 = vsel %vm564_vm14, %v563_v49, %v558_v51 }
 0x1c9   :  { %567 = vst [vmem:[%s945_s5] sm:$0x1] %v565_v52 }

</bundles_post_ra>
